<compile_context>
chip_gen: v5e
topology: v5e:2x2
jax: 0.10.0
libtpu: 0.0.40
codegen_flags: <defaults>
</compile_context>

<pallas_src>
import functools
import math

import jax
import jax.numpy as jnp
from jax.experimental import pallas as pl
from jax.experimental.pallas import tpu as pltpu


def _label_smoothing_kernel(n_valid_ref, target_ref, x_ref, out_ref, *,
                            confidence, fill):
    """One row-tile of the smoothed-KL loss; writes one f32 partial per block.

    sum_c t*(log t - logp)
        = [conf*log(conf) + (C-1)*fill*log(fill)]            (trace-time const)
        - [fill*sum_c x + (conf - fill)*x_tgt - lse]         (fill*(C-1)+conf == 1)
    """
    x = x_ref[...].astype(jnp.float32)            # (TN, C)
    tgt = target_ref[...]                         # (TN, 1) int32
    tn, c = x.shape

    # Numerically-stable logsumexp per row (the only EUP work in the kernel).
    m = jnp.max(x, axis=-1, keepdims=True)
    lse = jnp.log(jnp.sum(jnp.exp(x - m), axis=-1, keepdims=True)) + m    # (TN,1)

    row_sum_x = jnp.sum(x, axis=-1, keepdims=True)                        # (TN,1)
    col = jax.lax.broadcasted_iota(jnp.int32, x.shape, 1)
    x_tgt = jnp.sum(jnp.where(col == tgt, x, 0.0), axis=-1, keepdims=True)

    # sum_c t*logp ; the lse coefficient is fill*(C-1)+conf == 1.
    cross = fill * row_sum_x + (confidence - fill) * x_tgt - lse

    # sum_c t*log t : trace-time constant (guards 0*log 0).
    ent = 0.0
    if confidence > 0.0:
        ent += confidence * math.log(confidence)
    if fill > 0.0:
        ent += (c - 1) * fill * math.log(fill)

    loss = ent - cross                                                    # (TN,1)

    # Zero rows beyond n_valid (ragged last block / caller-side padding).
    # select does not propagate values (incl. NaN) from the masked branch.
    n_valid = n_valid_ref[0]
    rows = pl.program_id(0) * tn + jax.lax.broadcasted_iota(jnp.int32, (tn, 1), 0)
    loss = jnp.where(rows < n_valid, loss, 0.0)

    # One partial per block, written as a single (8,1) tile (scalar at row 0).
    partial = jnp.sum(loss, axis=0, keepdims=True)                        # (1,1)
    sub = jax.lax.broadcasted_iota(jnp.int32, (8, 1), 0)
    out_ref[...] = jnp.where(sub == 0, partial, 0.0)


def _round_up(a, b):
    return (a + b - 1) // b * b


def _vmem_capacity_bytes():
    try:
        cap = getattr(pltpu.get_tpu_info(), "vmem_capacity_bytes", None)
        if cap:
            return int(cap)
    except Exception:
        pass
    return 64 << 20      # conservative fallback: assume v7x-sized (64 MiB) VMEM


def _choose_tile_rows(n, c, vmem_capacity):
    # Size on the f32-widened footprint (kernel casts x to f32), so bf16/fp8
    # inputs don't silently blow past the VMEM budget after the cast.
    bytes_per_row = c * 4
    if vmem_capacity >= (96 << 20):          # v5e / v6e: 128 MiB physical VMEM
        target_block_bytes = 8 << 20
    else:                                    # v7x (64 MiB per TC) or unknown
        target_block_bytes = 4 << 20
    rows = max(8, target_block_bytes // max(1, bytes_per_row))
    rows = min(rows, _round_up(n, 8))        # don't exceed the problem size
    return max(8, (rows // 8) * 8)


def label_smoothing_loss(x, target, size, smoothing=0.0, *,
                         n_valid=None, tile_rows=None):
    """Pallas TPU LabelSmoothing.forward (scalar loss, KLDiv reduction='sum').

    n_valid (optional) lets callers pass a fixed-size padded batch and only
    count the first n_valid rows, without recompiling per logical batch size.
    """
    assert x.ndim == 2 and x.shape[1] == size and size > 1
    n, c = x.shape
    if n_valid is None:
        n_valid = n

    confidence = 1.0 - smoothing
    fill = smoothing / (size - 1)

    vmem_cap = _vmem_capacity_bytes()
    if tile_rows is None:
        tile_rows = _choose_tile_rows(n, c, vmem_cap)
    num_blocks = pl.cdiv(n, tile_rows)
    vmem_limit = (96 << 20) if vmem_cap >= (96 << 20) else (40 << 20)

    target2d = target.astype(jnp.int32).reshape(n, 1)
    n_valid_arr = jnp.minimum(jnp.asarray(n_valid, jnp.int32), n).reshape(1)

    kernel = functools.partial(_label_smoothing_kernel,
                               confidence=confidence, fill=fill)

    # TODO(synk): for C < 128, pack k=128//C rows per lane-row (contiguous
    # reshape + segmented lane reductions) to recover full lane occupancy.
    partials = pl.pallas_call(
        kernel,
        out_shape=jax.ShapeDtypeStruct((num_blocks * 8, 1), jnp.float32),
        grid_spec=pltpu.PrefetchScalarGridSpec(
            num_scalar_prefetch=1,                       # n_valid -> SMEM
            grid=(num_blocks,),
            in_specs=[
                pl.BlockSpec((tile_rows, 1), lambda i, nv: (i, 0)),   # targets
                pl.BlockSpec((tile_rows, c), lambda i, nv: (i, 0)),   # logits
            ],
            out_specs=pl.BlockSpec((8, 1), lambda i, nv: (i, 0)),
        ),
        compiler_params=pltpu.CompilerParams(
            dimension_semantics=("parallel",),   # independent blocks -> megacore
            vmem_limit_bytes=vmem_limit),
    )(n_valid_arr, target2d, x)

    # Padded / masked rows already contribute 0; tiny final reduction in XLA.
    return jnp.sum(partials)


def _reference(x, target, size, smoothing):
    # Pure-JAX reference mirroring the PyTorch module (KLDivLoss sum reduction).
    confidence = 1.0 - smoothing
    fill = smoothing / (size - 1)
    logp = jax.nn.log_softmax(x.astype(jnp.float32), axis=1)
    t = jnp.full_like(logp, fill)
    t = t.at[jnp.arange(x.shape[0]), target].set(confidence)
    term = jnp.where(t > 0, t * (jnp.log(jnp.maximum(t, 1e-38)) - logp), 0.0)
    return jnp.sum(term)


if __name__ == "__main__":
    key = jax.random.PRNGKey(0)
    size = 32
    k1, k2, k3, k4, k5, k6 = jax.random.split(key, 6)

    # Case 1: N divisible by the tile, smoothing=0.1.
    x1 = jax.random.normal(k1, (16, size), dtype=jnp.float32)
    t1 = jax.random.randint(k2, (16,), 0, size, dtype=jnp.int32)
    loss1 = jax.block_until_ready(label_smoothing_loss(x1, t1, size, 0.1))
    ref1 = _reference(x1, t1, size, 0.1)
    assert jnp.allclose(loss1, ref1, rtol=1e-5, atol=1e-5), (loss1, ref1)

    # Case 2: ragged N (exercises OOB last-block read + row masking), smoothing=0.
    x2 = jax.random.normal(k3, (13, size), dtype=jnp.float32)
    t2 = jax.random.randint(k4, (13,), 0, size, dtype=jnp.int32)
    loss2 = jax.block_until_ready(label_smoothing_loss(x2, t2, size, 0.0))
    ref2 = _reference(x2, t2, size, 0.0)
    assert jnp.allclose(loss2, ref2, rtol=1e-5, atol=1e-5), (loss2, ref2)

    # Case 3: fixed-shape padded batch with NaN-filled pad rows + explicit
    # n_valid -> verifies the mask discards garbage rows without propagation.
    x3 = jax.random.normal(k5, (16, size), dtype=jnp.float32)
    x3 = x3.at[13:].set(jnp.nan)
    t3 = jax.random.randint(k6, (16,), 0, size, dtype=jnp.int32)
    loss3 = jax.block_until_ready(
        label_smoothing_loss(x3, t3, size, 0.1, n_valid=13))
    ref3 = _reference(x3[:13], t3[:13], size, 0.1)
    assert jnp.allclose(loss3, ref3, rtol=1e-5, atol=1e-5), (loss3, ref3)

    # Case 4: multi-block grid with a ragged last block (explicit tile_rows).
    x4 = jax.random.normal(k1, (20, size), dtype=jnp.float32)
    t4 = jax.random.randint(k2, (20,), 0, size, dtype=jnp.int32)
    loss4 = jax.block_until_ready(
        label_smoothing_loss(x4, t4, size, 0.1, tile_rows=8))
    ref4 = _reference(x4, t4, size, 0.1)
    assert jnp.allclose(loss4, ref4, rtol=1e-5, atol=1e-5), (loss4, ref4)

    print("KERNEL_OK")
</pallas_src>

<mosaic_0001>
module attributes {stable_mosaic.version = 11 : i64} {
  func.func @_label_smoothing_kernel(%arg0: i32, %arg1: memref<1xi32, #tpu.memory_space<smem>>, %arg2: memref<16x1xi32, #tpu.memory_space<vmem>>, %arg3: memref<16x32xf32, #tpu.memory_space<vmem>>, %arg4: memref<8x1xf32, #tpu.memory_space<vmem>>) attributes {dimension_semantics = [#tpu.dimension_semantics<parallel>], iteration_bounds = array<i64: 1>, scalar_prefetch = 1 : i64, scratch_operands = 0 : i64, tpu.core_type = #tpu.core_type<tc>, window_params = [{transform_indices = @transform_0, window_bounds = array<i64: 16, 1>}, {transform_indices = @transform_1, window_bounds = array<i64: 16, 32>}, {transform_indices = @transform_2, window_bounds = array<i64: 8, 1>}]} {
    %c0 = arith.constant 0 : index
    %c0_0 = arith.constant 0 : index
    %0 = vector.load %arg3[%c0, %c0_0] : memref<16x32xf32, #tpu.memory_space<vmem>>, vector<16x32xf32>
    %c0_1 = arith.constant 0 : index
    %c0_2 = arith.constant 0 : index
    %1 = vector.load %arg2[%c0_1, %c0_2] : memref<16x1xi32, #tpu.memory_space<vmem>>, vector<16x1xi32>
    %cst = arith.constant dense<0xFF800000> : vector<16xf32>
    %2 = vector.multi_reduction <maximumf>, %0, %cst [1] : vector<16x32xf32> to vector<16xf32>
    %3 = vector.shape_cast %2 : vector<16xf32> to vector<16x1xf32>
    %4 = vector.broadcast %3 : vector<16x1xf32> to vector<16x32xf32>
    %5 = arith.subf %0, %4 : vector<16x32xf32>
    %6 = math.exp %5 : vector<16x32xf32>
    %cst_3 = arith.constant dense<0.000000e+00> : vector<16xf32>
    %7 = vector.multi_reduction <add>, %6, %cst_3 [1] : vector<16x32xf32> to vector<16xf32>
    %8 = vector.shape_cast %7 : vector<16xf32> to vector<16x1xf32>
    %9 = math.log %8 : vector<16x1xf32>
    %10 = arith.addf %9, %3 : vector<16x1xf32>
    %cst_4 = arith.constant dense<0.000000e+00> : vector<16xf32>
    %11 = vector.multi_reduction <add>, %0, %cst_4 [1] : vector<16x32xf32> to vector<16xf32>
    %12 = vector.shape_cast %11 : vector<16xf32> to vector<16x1xf32>
    %13 = tpu.iota {dimensions = array<i32: 1>} : vector<16x32xi32>
    %14 = vector.broadcast %1 : vector<16x1xi32> to vector<16x32xi32>
    %15 = arith.cmpi eq, %13, %14 : vector<16x32xi32>
    %cst_5 = arith.constant 0.000000e+00 : f32
    %16 = vector.broadcast %cst_5 : f32 to vector<16x32xf32>
    %17 = arith.select %15, %0, %16 : vector<16x32xi1>, vector<16x32xf32>
    %cst_6 = arith.constant dense<0.000000e+00> : vector<16xf32>
    %18 = vector.multi_reduction <add>, %17, %cst_6 [1] : vector<16x32xf32> to vector<16xf32>
    %19 = vector.shape_cast %18 : vector<16xf32> to vector<16x1xf32>
    %cst_7 = arith.constant 0.0032258064 : f32
    %20 = vector.broadcast %cst_7 : f32 to vector<16x1xf32>
    %21 = arith.mulf %20, %12 : vector<16x1xf32>
    %cst_8 = arith.constant 0.896774172 : f32
    %22 = vector.broadcast %cst_8 : f32 to vector<16x1xf32>
    %23 = arith.mulf %22, %19 : vector<16x1xf32>
    %24 = arith.addf %21, %23 : vector<16x1xf32>
    %25 = arith.subf %24, %10 : vector<16x1xf32>
    %cst_9 = arith.constant -0.668481708 : f32
    %26 = vector.broadcast %cst_9 : f32 to vector<16x1xf32>
    %27 = arith.subf %26, %25 : vector<16x1xf32>
    %c0_10 = arith.constant 0 : index
    %28 = memref.load %arg1[%c0_10] : memref<1xi32, #tpu.memory_space<smem>>
    %c16_i32 = arith.constant 16 : i32
    %29 = arith.muli %arg0, %c16_i32 : i32
    %30 = tpu.iota {dimensions = array<i32: 0>} : vector<16x1xi32>
    %31 = vector.broadcast %29 : i32 to vector<16x1xi32>
    %32 = arith.addi %31, %30 : vector<16x1xi32>
    %33 = vector.broadcast %28 : i32 to vector<16x1xi32>
    %34 = arith.cmpi slt, %32, %33 : vector<16x1xi32>
    %cst_11 = arith.constant 0.000000e+00 : f32
    %35 = vector.broadcast %cst_11 : f32 to vector<16x1xf32>
    %36 = arith.select %34, %27, %35 : vector<16x1xi1>, vector<16x1xf32>
    %cst_12 = arith.constant dense<0.000000e+00> : vector<1xf32>
    %37 = vector.multi_reduction <add>, %36, %cst_12 [0] : vector<16x1xf32> to vector<1xf32>
    %38 = vector.shape_cast %37 : vector<1xf32> to vector<1x1xf32>
    %39 = tpu.iota {dimensions = array<i32: 0>} : vector<8x1xi32>
    %c0_i32 = arith.constant 0 : i32
    %40 = vector.broadcast %c0_i32 : i32 to vector<8x1xi32>
    %41 = arith.cmpi eq, %39, %40 : vector<8x1xi32>
    %cst_13 = arith.constant 0.000000e+00 : f32
    %42 = vector.shape_cast %38 : vector<1x1xf32> to vector<1x1xf32>
    %43 = vector.broadcast %42 : vector<1x1xf32> to vector<8x1xf32>
    %44 = vector.broadcast %cst_13 : f32 to vector<8x1xf32>
    %45 = arith.select %41, %43, %44 : vector<8x1xi1>, vector<8x1xf32>
    %c0_14 = arith.constant 0 : index
    %c0_15 = arith.constant 0 : index
    %46 = vector.load %arg4[%c0_14, %c0_15] : memref<8x1xf32, #tpu.memory_space<vmem>>, vector<8x1xf32>
    tpu.vector_store %arg4[%c0_14, %c0_15], %45 {strides = array<i32>} : memref<8x1xf32, #tpu.memory_space<vmem>>, vector<8x1xf32>,
    return
  }
  func.func @transform_0(%arg0: i32, %arg1: memref<1xi32, #tpu.memory_space<smem>>) -> (i32, i32) {
    %c0_i32 = arith.constant 0 : i32
    %c0_i32_0 = arith.constant 0 : i32
    return %arg0, %c0_i32 : i32, i32
  }
  func.func @transform_1(%arg0: i32, %arg1: memref<1xi32, #tpu.memory_space<smem>>) -> (i32, i32) {
    %c0_i32 = arith.constant 0 : i32
    %c0_i32_0 = arith.constant 0 : i32
    return %arg0, %c0_i32 : i32, i32
  }
  func.func @transform_2(%arg0: i32, %arg1: memref<1xi32, #tpu.memory_space<smem>>) -> (i32, i32) {
    %c0_i32 = arith.constant 0 : i32
    %c0_i32_0 = arith.constant 0 : i32
    return %arg0, %c0_i32 : i32, i32
  }
}

</mosaic_0001>

<bundles_post_ra>
// kernel: tpu_custom_call.1
= control target key start
LH: loop header
LB: loop body
LE: loop exit
PB: predicated region body
PF: predicated region fallthrough
CT: control target
= control target key end

     0   :  { %vm17_vm0 = vcmask 261120   ;;  %v115_v1 = vmov 0   ;;  %v48_v10 = vlaneseq  ;;  %vm98_vm6 = vcmask 7168   ;;  %s162_s2 = inlined_call_operand.vmem [shape: f32[16,32], index: 2, kind: input, shape index: {}]   ;;  %s163_s1 = inlined_call_operand.vmem [shape: s32[16,1], index: 1, kind: input, shape index: {}]   ;;  %s164_s0 = inlined_call_operand.<no memory space> [shape: s32[1], index: 0, kind: input, shape index: {}]   ;;  %s165_s3 = inlined_call_operand.vmem [shape: f32[8,1], index: 3, kind: output, shape index: {}]  }
   0x1   :  { %v13_v0 = vld [vmem:[%s162_s2] sm:$0xff]  ;;  %105 = vset.pattern.permute.xlu1 %v115_v1  ;;  %106 = vset.pattern.permute.xlu0 %v115_v1  ;;  %v14_v4 = vld [vmem:[%s162_s2 + $0x8] sm:$0xff]  ;;  %v84_v45 = vstv %s164_s0 }
   0x2   :  { %v15_v2 = vld [vmem:[%s163_s1] sm:$0xff]  ;;  %v18_v3 = vsel %vm17_vm0, %v13_v0, -inf  ;;  %v16_v5 = vld [vmem:[%s163_s1 + $0x8] sm:$0xff]  ;;  %v21_v6 = vsel %vm17_vm0, %v14_v4, -inf  ;;  %v42_v7 = vsel %vm17_vm0, %v13_v0, 0.0  ;;  %v45_v8 = vsel %vm17_vm0, %v14_v4, 0.0 }
   0x3   :  { %51 = vperm.xlu1 %105, %v15_v2   ;;  %19 = vmax.xlane.f32.xlu0 %v18_v3  ;;  %v49_v14 = vand.u32 127, %v48_v10  ;;  %v79_v33 = vshrl.u32 %v48_v10, 7 }
   0x5   :  { %v80_v41 = vadd.s32 8, %v79_v33  ;;  %vm85_vm4 = vcmp.lt.s32.totalorder %v79_v33, %v84_v45  ;;  %vm96_vm5 = vcmp.eq.s32.totalorder %v79_v33, 0 }
   0x7   :  { %vm86_vm3 = vcmp.lt.s32.totalorder %v80_v41, %v84_v45 }
   0xb   :  { %54 = vperm.xlu1 %105, %v16_v5   ;;  %22 = vmax.xlane.f32.xlu0 %v21_v6 }
  0x13   :  { %43 = vadd.xlane.f32.xlu0 %v42_v7 }
  0x35   :  { %46 = vadd.xlane.f32.xlu1 %v45_v8 }
  0x75   :  { %v52_v9 = vpop.permute.xlu1 %51 }
  0x76   :  { %v20_v11 = vpop.xlane.xlu0 %19  ;;  %vm56_vm2 = vcmp.eq.s32.totalorder %v49_v14, %v52_v9 }
  0x77   :  { %v24_v12 = vsub.f32 %v13_v0, %v20_v11  ;;  %v58_v25 = vsel %vm56_vm2, %v13_v0, 0.0 }
  0x78   :  { %v60_v26 = vsel %vm17_vm0, %v58_v25, 0.0 }
  0x79   :  { %v26_v13 = vmul.f32 1.442695, %v24_v12 }
  0x7b   :  { %107 = vpow2.f32 %v26_v13 }
  0x7d   :  { %v55_v15 = vpop.permute.xlu1 %54 }
  0x7e   :  { %vm57_vm1 = vcmp.eq.s32.totalorder %v49_v14, %v55_v15  ;;  %v23_v16 = vpop.xlane.xlu0 %22 }
  0x7f   :  { %v59_v17 = vsel %vm57_vm1, %v14_v4, 0.0  ;;  %v25_v18 = vsub.f32 %v14_v4, %v23_v16 }
  0x80   :  { %v63_v19 = vsel %vm17_vm0, %v59_v17, 0.0 }
  0x81   :  { %64 = vadd.xlane.f32.xlu0 %v63_v19  ;;  %v108_v20 = vpop.eup %107  ;;  %v28_v21 = vmul.f32 1.442695, %v25_v18 }
  0x82   :  { %v30_v22 = vsel %vm17_vm0, %v108_v20, 0.0 }
  0x83   :  { %109 = vpow2.f32 %v28_v21  ;;  %31 = vadd.xlane.f32.xlu2 %v30_v22 }
  0x86   :  { %v44_v28 = vpop.xlane.xlu0 %43 }
  0x87   :  { %v66_v40 = vmul.f32 0.0032258064, %v44_v28 }
  0x89   :  { %v110_v23 = vpop.eup %109 }
  0x8a   :  { %v33_v24 = vsel %vm17_vm0, %v110_v23, 0.0 }
  0x8b   :  { %34 = vadd.xlane.f32.xlu2 %v33_v24 }
  0x93   :  { %61 = vadd.xlane.f32.xlu2 %v60_v26 }
  0xa8   :  { %v47_v31 = vpop.xlane.xlu1 %46 }
  0xa9   :  { %v67_v35 = vmul.f32 0.0032258064, %v47_v31 }
  0xf4   :  { %v65_v30 = vpop.xlane.xlu0 %64 }
  0xf5   :  { %v69_v34 = vmul.f32 0.8967742, %v65_v30 }
  0xf6   :  { %v32_v27 = vpop.xlane.xlu2 %31 }
  0xf7   :  { %111 = vlog2.f32 %v32_v27  ;;  %v71_v44 = vadd.f32 %v69_v34, %v67_v35 }
  0xfd   :  { %v112_v32 = vpop.eup %111 }
  0xfe   :  { %v35_v29 = vpop.xlane.xlu2 %34  ;;  %v37_v37 = vmul.f32 0.6931472, %v112_v32 }
  0xff   :  { %113 = vlog2.f32 %v35_v29 }
 0x100   :  { %v40_v46 = vadd.f32 %v37_v37, %v20_v11 }
 0x105   :  { %v114_v36 = vpop.eup %113 }
 0x106   :  { %v39_v38 = vmul.f32 0.6931472, %v114_v36  ;;  %v62_v39 = vpop.xlane.xlu2 %61 }
 0x107   :  { %v68_v42 = vmul.f32 0.8967742, %v62_v39 }
 0x108   :  { %v41_v43 = vadd.f32 %v39_v38, %v23_v16 }
 0x109   :  { %v70_v47 = vadd.f32 %v68_v42, %v66_v40 }
 0x10a   :  { %v73_v48 = vsub.f32 %v71_v44, %v41_v43 }
 0x10b   :  { %v72_v49 = vsub.f32 %v70_v47, %v40_v46 }
 0x10c   :  { %v75_v50 = vsub.f32 -0.6684817, %v73_v48 }
 0x10d   :  { %v74_v51 = vsub.f32 -0.6684817, %v72_v49 }
 0x10e   :  { %v88_v52 = vsel %vm86_vm3, %v75_v50, 0.0 }
 0x10f   :  { %v87_v53 = vsel %vm85_vm4, %v74_v51, 0.0 }
 0x110   :  { %v89_v54 = vadd.f32 %v88_v52, %v87_v53 }
 0x112   :  { %v90_v55 = vrot.slane %v89_v54, 4 }
 0x114   :  { %v91_v56 = vadd.f32 %v90_v55, %v89_v54 }
 0x116   :  { %v92_v57 = vrot.slane %v91_v56, 2 }
 0x118   :  { %v93_v58 = vadd.f32 %v92_v57, %v91_v56 }
 0x11a   :  { %v94_v59 = vrot.slane %v93_v58, 1 }
 0x11c   :  { %v95_v60 = vadd.f32 %v94_v59, %v93_v58 }
 0x11e   :  { %v97_v61 = vsel %vm96_vm5, %v95_v60, 0.0 }
 0x11f   :  { %99 = vst.msk [vmem:[%s165_s3] sm:$0xff] %vm98_vm6, %v97_v61 }

</bundles_post_ra>
